<compile_context>
chip_gen: v5e
topology: v5e:2x2
jax: 0.10.0
libtpu: 0.0.40
codegen_flags: <defaults>
</compile_context>

<pallas_src>
import numpy as np
import jax
import jax.numpy as jnp
from jax.experimental import pallas as pl
from jax.experimental.pallas import tpu as pltpu

_LANE = 128


def _round_up(x, m):
    return ((x + m - 1) // m) * m


def _vmem_config():
    """Generation-aware (budget_for_tiling, vmem_limit_bytes)."""
    try:
        cap = int(pltpu.get_tpu_info().vmem_capacity_bytes)
    except Exception:
        cap = 64 << 20                      # conservative (v7x per-TC size)
    if cap >= (96 << 20):                   # v5e / v6e: 128 MiB physical
        limit = 48 << 20
    else:                                   # v7x: 64 MiB per TensorCore
        limit = 40 << 20
    budget = limit - (8 << 20)              # headroom for Mosaic-internal scratch
    return budget, limit


def _make_mlp_kernel(num_linear, compute_dtype):
    """Kernel signature: (x_ref, w0, b0, w1, b1, ..., out_ref), all VMEM blocks."""
    is_bf16 = jnp.dtype(compute_dtype) == jnp.dtype(jnp.bfloat16)
    elu_dtype = jnp.bfloat16 if is_bf16 else jnp.float32

    def kernel(x_ref, *refs):
        out_ref = refs[-1]
        h = x_ref[...].astype(compute_dtype)
        for i in range(num_linear):
            w = refs[2 * i][...]                  # compute_dtype (bf16 or f32)
            b = refs[2 * i + 1][...]              # (1, dim) f32, broadcasts over rows
            acc = jnp.dot(h, w, preferred_element_type=jnp.float32) + b
            if i < num_linear - 1:
                a = acc.astype(elu_dtype)
                # ELU (alpha=1.0). Clamp the exp argument so the untaken branch
                # never overflows; exp goes to the EUP slot (bf16 on v6e/v7x).
                a = jnp.where(a > 0, a, jnp.exp(jnp.minimum(a, 0.0)) - 1.0)
                h = a.astype(compute_dtype)
            else:
                out_ref[...] = acc.astype(out_ref.dtype)

    return kernel


def init_dense_model_params(key, feature_size, output_shape, layers, hidden_size):
    """Deterministic PyTorch-style (uniform +/- 1/sqrt(fan_in)) init. f32, unpadded."""
    dims = [feature_size] + [hidden_size] * layers + [int(np.prod(output_shape))]
    params = []
    for i in range(len(dims) - 1):
        fan_in, fan_out = dims[i], dims[i + 1]
        key, kw, kb = jax.random.split(key, 3)
        bound = 1.0 / np.sqrt(fan_in)
        w = jax.random.uniform(kw, (fan_in, fan_out), jnp.float32, -bound, bound)
        b = jax.random.uniform(kb, (1, fan_out), jnp.float32, -bound, bound)
        params += [w, b]
    return params


def prepare_dense_model_params(params, *, compute_dtype=jnp.bfloat16,
                               width_multiple=_LANE):
    """One-time kernel-friendly preparation of the parameters.

    * hidden / output widths zero-padded to multiples of `width_multiple`
      (128 default; set 256 on v6e/v7x for large hidden widths to fill the
      256-deep MXU) -> lane-dense intermediates and unmasked output stores,
    * the layer-0 input (feature) width is padded only when the extra HBM read
      traffic is <= 25% (e.g. 230 -> 256 yes, 32 -> 128 no),
    * weights cast to `compute_dtype` (bf16 by default), biases kept f32.
    Zero padding is mathematically inert for ELU MLPs.
    """
    num_linear = len(params) // 2
    prepared = []
    for i in range(num_linear):
        w = jnp.asarray(params[2 * i])
        b = jnp.asarray(params[2 * i + 1]).reshape(1, -1)
        fan_in, fan_out = w.shape
        if i == 0:
            f_pad = (-fan_in) % _LANE
            in_pad = f_pad if 4 * (fan_in + f_pad) <= 5 * fan_in else 0
        else:
            in_pad = (-fan_in) % width_multiple
        out_pad = (-fan_out) % width_multiple
        w = jnp.pad(w, ((0, in_pad), (0, out_pad))).astype(compute_dtype)
        b = jnp.pad(b, ((0, 0), (0, out_pad))).astype(jnp.float32)
        prepared += [w, b]
    return prepared


def _choose_row_tile(desired, n_rows, f_in, x_itemsize, max_width, p_pad,
                     out_itemsize, weight_bytes, vmem_budget_bytes):
    """Largest multiple-of-8 row tile that fits the (corrected) VMEM model."""
    rt = _round_up(min(desired, max(n_rows, 8)), 8)
    while rt > 8:
        need = (2 * rt * f_in * x_itemsize        # double-buffered x tile
                + 2 * rt * p_pad * out_itemsize   # double-buffered out tile
                + rt * max_width * 4              # f32 working set (one live layer)
                + weight_bytes)                   # single-buffered resident weights
        if need <= vmem_budget_bytes:
            break
        rt = _round_up(rt // 2, 8)
    return max(rt, 8)


def _pick_divisible_tile(n_rows, max_tile):
    """Return (tile, row_pad): prefer a tile that divides n_rows exactly."""
    max_tile = max(8, (max_tile // 8) * 8)
    if n_rows % 8 == 0:
        t = min(max_tile, n_rows)
        t = (t // 8) * 8
        floor = max(8, max_tile // 4)
        while t >= floor:
            if n_rows % t == 0:
                return t, 0
            t -= 8
    return max_tile, (-n_rows) % max_tile


def dense_model_forward(features, prepared_params, output_shape, *, row_tile=1024,
                        out_dtype=None):
    """Runs the fused MLP Pallas kernel on `prepare_dense_model_params` output.

    features: [..., feature_size]  ->  distribution parameters of shape
    features.shape[:-1] + output_shape (mean for 'normal', logits for 'binary').
    """
    feature_size = features.shape[-1]
    lead_shape = features.shape[:-1]
    n_rows = int(np.prod(lead_shape)) if lead_shape else 1
    p_out = int(np.prod(output_shape))
    num_linear = len(prepared_params) // 2
    p_pad = prepared_params[-2].shape[-1]           # padded (lane-dense) output width
    f_expected = prepared_params[0].shape[0]        # possibly lane-padded feature width
    compute_dtype = prepared_params[0].dtype
    if out_dtype is None:
        out_dtype = features.dtype
    out_itemsize = jnp.dtype(out_dtype).itemsize

    x2d = features.reshape(n_rows, feature_size)
    col_pad = f_expected - feature_size

    vmem_budget, vmem_limit = _vmem_config()
    weight_bytes = sum(int(np.prod(p.shape)) * p.dtype.itemsize for p in prepared_params)
    widths = [f_expected] + [prepared_params[2 * i].shape[-1] for i in range(num_linear)]
    tile = _choose_row_tile(row_tile, n_rows, f_expected, x2d.dtype.itemsize,
                            max(widths), p_pad, out_itemsize, weight_bytes, vmem_budget)

    # Keep >=2 grid steps so "parallel" semantics can shard across v7x's 2 TCs.
    if n_rows > 16:
        tile = min(tile, _round_up(pl.cdiv(n_rows, 2), 8))
    tile = min(tile, _round_up(n_rows, 8))

    # Prefer a tile that divides n_rows exactly (avoids an HBM copy of x).
    tile, row_pad = _pick_divisible_tile(n_rows, tile)

    if row_pad or col_pad:
        x2d = jnp.pad(x2d, ((0, row_pad), (0, col_pad)))
    n_padded = x2d.shape[0]
    grid = (n_padded // tile,)

    kernel = _make_mlp_kernel(num_linear, compute_dtype)

    flops = 2 * n_padded * sum(
        int(np.prod(prepared_params[2 * i].shape)) for i in range(num_linear))
    transcendentals = n_padded * sum(
        int(prepared_params[2 * i].shape[-1]) for i in range(num_linear - 1))
    bytes_accessed = (n_padded * f_expected * x2d.dtype.itemsize
                      + weight_bytes
                      + n_padded * p_pad * out_itemsize)

    def run(single_buffer_weights):
        # x tiled over rows; weights/biases are full, grid-invariant blocks.
        in_specs = [pl.BlockSpec((tile, f_expected), lambda i: (i, 0))]
        for p in prepared_params:
            if single_buffer_weights:
                in_specs.append(pl.BlockSpec(p.shape, lambda i: (0, 0),
                                             pipeline_mode=pl.Buffered(1)))
            else:
                in_specs.append(pl.BlockSpec(p.shape, lambda i: (0, 0)))
        out_spec = pl.BlockSpec((tile, p_pad), lambda i: (i, 0))   # lane-dense slab

        return pl.pallas_call(
            kernel,
            out_shape=jax.ShapeDtypeStruct((n_padded, p_pad), out_dtype),
            grid_spec=pltpu.PrefetchScalarGridSpec(
                num_scalar_prefetch=0,
                grid=grid,
                in_specs=in_specs,
                out_specs=out_spec,
            ),
            compiler_params=pltpu.CompilerParams(
                dimension_semantics=("parallel",),
                vmem_limit_bytes=vmem_limit,
            ),
            cost_estimate=pl.CostEstimate(
                flops=int(flops),
                transcendentals=int(transcendentals),
                bytes_accessed=int(bytes_accessed),
            ),
        )(x2d, *prepared_params)

    try:
        out2d = run(True)       # single-buffered (fetched-once) weights
    except Exception:
        out2d = run(False)      # portable fallback: default double-buffering

    out2d = out2d[:n_rows, :p_out]
    return out2d.reshape(lead_shape + tuple(output_shape))


def dense_model_forward_ref(features, params, output_shape):
    """Plain-JAX reference (unpadded f32 params) for correctness checks."""
    num_linear = len(params) // 2
    h = features.astype(jnp.float32)
    for i in range(num_linear):
        w, b = params[2 * i], params[2 * i + 1]
        h = h @ w + b[0]
        if i < num_linear - 1:
            h = jnp.where(h > 0, h, jnp.exp(jnp.minimum(h, 0.0)) - 1.0)
    return h.reshape(features.shape[:-1] + tuple(output_shape))


if __name__ == "__main__":
    # Small DenseModel config: feature_size=32, output_shape=(4,4),
    # layers=2, hidden_size=32, dist='normal'
    feature_size = 32
    output_shape = (4, 4)
    layers = 2
    hidden_size = 32

    key = jax.random.PRNGKey(0)
    kp, kx = jax.random.split(key)

    params = init_dense_model_params(
        kp, feature_size, output_shape, layers, hidden_size
    )

    # features: [batch=2, seq=8, feature=32]
    features = jax.random.normal(kx, (2, 8, feature_size), jnp.float32)

    ref = dense_model_forward_ref(features, params, output_shape)

    # Production path: bf16 weights, f32 accumulation -> loose tolerance.
    params_bf16 = prepare_dense_model_params(params, compute_dtype=jnp.bfloat16)
    out_bf16 = jax.block_until_ready(
        dense_model_forward(features, params_bf16, output_shape))
    assert out_bf16.shape == (2, 8) + output_shape, out_bf16.shape
    np.testing.assert_allclose(
        np.asarray(out_bf16), np.asarray(ref), rtol=5e-2, atol=5e-2)

    # Exact path: f32 operands (padding must be numerically inert) -> tight tolerance.
    params_f32 = prepare_dense_model_params(params, compute_dtype=jnp.float32)
    out_f32 = jax.block_until_ready(
        dense_model_forward(features, params_f32, output_shape))
    assert out_f32.shape == (2, 8) + output_shape, out_f32.shape
    np.testing.assert_allclose(
        np.asarray(out_f32), np.asarray(ref), rtol=1e-5, atol=1e-5)

    # bf16 feature stream (producer already bf16): bf16 in, bf16 out.
    features_bf16 = features.astype(jnp.bfloat16)
    ref_bf16_in = dense_model_forward_ref(
        features_bf16.astype(jnp.float32), params, output_shape)
    out_bf16_io = jax.block_until_ready(
        dense_model_forward(features_bf16, params_bf16, output_shape))
    assert out_bf16_io.shape == (2, 8) + output_shape, out_bf16_io.shape
    np.testing.assert_allclose(
        np.asarray(out_bf16_io, dtype=np.float32), np.asarray(ref_bf16_in),
        rtol=7e-2, atol=7e-2)

    print("KERNEL_OK")
</pallas_src>

<mosaic_0001>
module attributes {stable_mosaic.version = 11 : i64} {
  func.func @kernel(%arg0: i32, %arg1: memref<16x32xf32, #tpu.memory_space<vmem>>, %arg2: memref<32x128xbf16, #tpu.memory_space<vmem>>, %arg3: memref<1x128xf32, #tpu.memory_space<vmem>>, %arg4: memref<128x128xbf16, #tpu.memory_space<vmem>>, %arg5: memref<1x128xf32, #tpu.memory_space<vmem>>, %arg6: memref<128x128xbf16, #tpu.memory_space<vmem>>, %arg7: memref<1x128xf32, #tpu.memory_space<vmem>>, %arg8: memref<16x128xf32, #tpu.memory_space<vmem>>) attributes {dimension_semantics = [#tpu.dimension_semantics<parallel>], iteration_bounds = array<i64: 1>, scalar_prefetch = 0 : i64, scratch_operands = 0 : i64, tpu.core_type = #tpu.core_type<tc>, window_params = [{transform_indices = @transform_0, window_bounds = array<i64: 16, 32>}, {pipeline_mode = #tpu.pipeline_mode<synchronous>, transform_indices = @transform_1, window_bounds = array<i64: 32, 128>}, {pipeline_mode = #tpu.pipeline_mode<synchronous>, transform_indices = @transform_2, window_bounds = array<i64: 1, 128>}, {pipeline_mode = #tpu.pipeline_mode<synchronous>, transform_indices = @transform_3, window_bounds = array<i64: 128, 128>}, {pipeline_mode = #tpu.pipeline_mode<synchronous>, transform_indices = @transform_4, window_bounds = array<i64: 1, 128>}, {pipeline_mode = #tpu.pipeline_mode<synchronous>, transform_indices = @transform_5, window_bounds = array<i64: 128, 128>}, {pipeline_mode = #tpu.pipeline_mode<synchronous>, transform_indices = @transform_6, window_bounds = array<i64: 1, 128>}, {transform_indices = @transform_7, window_bounds = array<i64: 16, 128>}]} {
    %c0 = arith.constant 0 : index
    %c0_0 = arith.constant 0 : index
    %0 = vector.load %arg1[%c0, %c0_0] : memref<16x32xf32, #tpu.memory_space<vmem>>, vector<16x32xf32>
    %1 = arith.truncf %0 : vector<16x32xf32> to vector<16x32xbf16>
    %c0_1 = arith.constant 0 : index
    %c0_2 = arith.constant 0 : index
    %2 = vector.load %arg2[%c0_1, %c0_2] : memref<32x128xbf16, #tpu.memory_space<vmem>>, vector<32x128xbf16>
    %c0_3 = arith.constant 0 : index
    %c0_4 = arith.constant 0 : index
    %3 = vector.load %arg3[%c0_3, %c0_4] : memref<1x128xf32, #tpu.memory_space<vmem>>, vector<1x128xf32>
    %cst = arith.constant dense<0.000000e+00> : vector<16x128xf32>
    %4 = tpu.matmul %1, %2, %cst {dimension_numbers = #tpu.dot_dimension_numbers<[1], [0], [0], [1], [0, 0, 1, 1], [], []>} : vector<16x32xbf16>, vector<32x128xbf16>, vector<16x128xf32> -> vector<16x128xf32>
    %5 = vector.broadcast %3 : vector<1x128xf32> to vector<16x128xf32>
    %6 = arith.addf %4, %5 : vector<16x128xf32>
    %7 = arith.truncf %6 : vector<16x128xf32> to vector<16x128xbf16>
    %cst_5 = arith.constant 0.000000e+00 : bf16
    %8 = vector.broadcast %cst_5 : bf16 to vector<16x128xbf16>
    %9 = arith.cmpf ogt, %7, %8 : vector<16x128xbf16>
    %cst_6 = arith.constant 0.000000e+00 : bf16
    %10 = vector.broadcast %cst_6 : bf16 to vector<16x128xbf16>
    %11 = arith.minimumf %7, %10 : vector<16x128xbf16>
    %12 = math.exp %11 : vector<16x128xbf16>
    %cst_7 = arith.constant 1.000000e+00 : bf16
    %13 = vector.broadcast %cst_7 : bf16 to vector<16x128xbf16>
    %14 = arith.subf %12, %13 : vector<16x128xbf16>
    %15 = arith.select %9, %7, %14 : vector<16x128xi1>, vector<16x128xbf16>
    %c0_8 = arith.constant 0 : index
    %c0_9 = arith.constant 0 : index
    %16 = vector.load %arg4[%c0_8, %c0_9] : memref<128x128xbf16, #tpu.memory_space<vmem>>, vector<128x128xbf16>
    %c0_10 = arith.constant 0 : index
    %c0_11 = arith.constant 0 : index
    %17 = vector.load %arg5[%c0_10, %c0_11] : memref<1x128xf32, #tpu.memory_space<vmem>>, vector<1x128xf32>
    %cst_12 = arith.constant dense<0.000000e+00> : vector<16x128xf32>
    %18 = tpu.matmul %15, %16, %cst_12 {dimension_numbers = #tpu.dot_dimension_numbers<[1], [0], [0], [1], [0, 0, 1, 1], [], []>} : vector<16x128xbf16>, vector<128x128xbf16>, vector<16x128xf32> -> vector<16x128xf32>
    %19 = vector.broadcast %17 : vector<1x128xf32> to vector<16x128xf32>
    %20 = arith.addf %18, %19 : vector<16x128xf32>
    %21 = arith.truncf %20 : vector<16x128xf32> to vector<16x128xbf16>
    %cst_13 = arith.constant 0.000000e+00 : bf16
    %22 = vector.broadcast %cst_13 : bf16 to vector<16x128xbf16>
    %23 = arith.cmpf ogt, %21, %22 : vector<16x128xbf16>
    %cst_14 = arith.constant 0.000000e+00 : bf16
    %24 = vector.broadcast %cst_14 : bf16 to vector<16x128xbf16>
    %25 = arith.minimumf %21, %24 : vector<16x128xbf16>
    %26 = math.exp %25 : vector<16x128xbf16>
    %cst_15 = arith.constant 1.000000e+00 : bf16
    %27 = vector.broadcast %cst_15 : bf16 to vector<16x128xbf16>
    %28 = arith.subf %26, %27 : vector<16x128xbf16>
    %29 = arith.select %23, %21, %28 : vector<16x128xi1>, vector<16x128xbf16>
    %c0_16 = arith.constant 0 : index
    %c0_17 = arith.constant 0 : index
    %30 = vector.load %arg6[%c0_16, %c0_17] : memref<128x128xbf16, #tpu.memory_space<vmem>>, vector<128x128xbf16>
    %c0_18 = arith.constant 0 : index
    %c0_19 = arith.constant 0 : index
    %31 = vector.load %arg7[%c0_18, %c0_19] : memref<1x128xf32, #tpu.memory_space<vmem>>, vector<1x128xf32>
    %cst_20 = arith.constant dense<0.000000e+00> : vector<16x128xf32>
    %32 = tpu.matmul %29, %30, %cst_20 {dimension_numbers = #tpu.dot_dimension_numbers<[1], [0], [0], [1], [0, 0, 1, 1], [], []>} : vector<16x128xbf16>, vector<128x128xbf16>, vector<16x128xf32> -> vector<16x128xf32>
    %33 = vector.broadcast %31 : vector<1x128xf32> to vector<16x128xf32>
    %34 = arith.addf %32, %33 : vector<16x128xf32>
    %c0_21 = arith.constant 0 : index
    %c0_22 = arith.constant 0 : index
    %35 = vector.load %arg8[%c0_21, %c0_22] : memref<16x128xf32, #tpu.memory_space<vmem>>, vector<16x128xf32>
    tpu.vector_store %arg8[%c0_21, %c0_22], %34 {strides = array<i32>} : memref<16x128xf32, #tpu.memory_space<vmem>>, vector<16x128xf32>,
    return
  }
  func.func @transform_0(%arg0: i32) -> (i32, i32) {
    %c0_i32 = arith.constant 0 : i32
    %c0_i32_0 = arith.constant 0 : i32
    return %arg0, %c0_i32 : i32, i32
  }
  func.func @transform_1(%arg0: i32) -> (i32, i32) {
    %c0_i32 = arith.constant 0 : i32
    %c0_i32_0 = arith.constant 0 : i32
    %c0_i32_1 = arith.constant 0 : i32
    return %c0_i32, %c0_i32_0 : i32, i32
  }
  func.func @transform_2(%arg0: i32) -> (i32, i32) {
    %c0_i32 = arith.constant 0 : i32
    %c0_i32_0 = arith.constant 0 : i32
    %c0_i32_1 = arith.constant 0 : i32
    return %c0_i32, %c0_i32_0 : i32, i32
  }
  func.func @transform_3(%arg0: i32) -> (i32, i32) {
    %c0_i32 = arith.constant 0 : i32
    %c0_i32_0 = arith.constant 0 : i32
    %c0_i32_1 = arith.constant 0 : i32
    return %c0_i32, %c0_i32_0 : i32, i32
  }
  func.func @transform_4(%arg0: i32) -> (i32, i32) {
    %c0_i32 = arith.constant 0 : i32
    %c0_i32_0 = arith.constant 0 : i32
    %c0_i32_1 = arith.constant 0 : i32
    return %c0_i32, %c0_i32_0 : i32, i32
  }
  func.func @transform_5(%arg0: i32) -> (i32, i32) {
    %c0_i32 = arith.constant 0 : i32
    %c0_i32_0 = arith.constant 0 : i32
    %c0_i32_1 = arith.constant 0 : i32
    return %c0_i32, %c0_i32_0 : i32, i32
  }
  func.func @transform_6(%arg0: i32) -> (i32, i32) {
    %c0_i32 = arith.constant 0 : i32
    %c0_i32_0 = arith.constant 0 : i32
    %c0_i32_1 = arith.constant 0 : i32
    return %c0_i32, %c0_i32_0 : i32, i32
  }
  func.func @transform_7(%arg0: i32) -> (i32, i32) {
    %c0_i32 = arith.constant 0 : i32
    %c0_i32_0 = arith.constant 0 : i32
    return %arg0, %c0_i32 : i32, i32
  }
}

module attributes {stable_mosaic.version = 11 : i64} {
  func.func @kernel(%arg0: i32, %arg1: memref<16x32xf32, #tpu.memory_space<vmem>>, %arg2: memref<32x128xbf16, #tpu.memory_space<vmem>>, %arg3: memref<1x128xf32, #tpu.memory_space<vmem>>, %arg4: memref<128x128xbf16, #tpu.memory_space<vmem>>, %arg5: memref<1x128xf32, #tpu.memory_space<vmem>>, %arg6: memref<128x128xbf16, #tpu.memory_space<vmem>>, %arg7: memref<1x128xf32, #tpu.memory_space<vmem>>, %arg8: memref<16x128xf32, #tpu.memory_space<vmem>>) attributes {dimension_semantics = [#tpu.dimension_semantics<parallel>], iteration_bounds = array<i64: 1>, scalar_prefetch = 0 : i64, scratch_operands = 0 : i64, tpu.core_type = #tpu.core_type<tc>, window_params = [{transform_indices = @transform_0, window_bounds = array<i64: 16, 32>}, {pipeline_mode = #tpu.pipeline_mode<synchronous>, transform_indices = @transform_1, window_bounds = array<i64: 32, 128>}, {pipeline_mode = #tpu.pipeline_mode<synchronous>, transform_indices = @transform_2, window_bounds = array<i64: 1, 128>}, {pipeline_mode = #tpu.pipeline_mode<synchronous>, transform_indices = @transform_3, window_bounds = array<i64: 128, 128>}, {pipeline_mode = #tpu.pipeline_mode<synchronous>, transform_indices = @transform_4, window_bounds = array<i64: 1, 128>}, {pipeline_mode = #tpu.pipeline_mode<synchronous>, transform_indices = @transform_5, window_bounds = array<i64: 128, 128>}, {pipeline_mode = #tpu.pipeline_mode<synchronous>, transform_indices = @transform_6, window_bounds = array<i64: 1, 128>}, {transform_indices = @transform_7, window_bounds = array<i64: 16, 128>}]} {
    %c0 = arith.constant 0 : index
    %c0_0 = arith.constant 0 : index
    %0 = vector.load %arg1[%c0, %c0_0] : memref<16x32xf32, #tpu.memory_space<vmem>>, vector<16x32xf32>
    %1 = arith.truncf %0 : vector<16x32xf32> to vector<16x32xbf16>
    %c0_1 = arith.constant 0 : index
    %c0_2 = arith.constant 0 : index
    %2 = vector.load %arg2[%c0_1, %c0_2] : memref<32x128xbf16, #tpu.memory_space<vmem>>, vector<32x128xbf16>
    %c0_3 = arith.constant 0 : index
    %c0_4 = arith.constant 0 : index
    %3 = vector.load %arg3[%c0_3, %c0_4] : memref<1x128xf32, #tpu.memory_space<vmem>>, vector<1x128xf32>
    %cst = arith.constant dense<0.000000e+00> : vector<16x128xf32>
    %4 = tpu.matmul %1, %2, %cst {dimension_numbers = #tpu.dot_dimension_numbers<[1], [0], [0], [1], [0, 0, 1, 1], [], []>} : vector<16x32xbf16>, vector<32x128xbf16>, vector<16x128xf32> -> vector<16x128xf32>
    %5 = vector.broadcast %3 : vector<1x128xf32> to vector<16x128xf32>
    %6 = arith.addf %4, %5 : vector<16x128xf32>
    %7 = arith.truncf %6 : vector<16x128xf32> to vector<16x128xbf16>
    %cst_5 = arith.constant 0.000000e+00 : bf16
    %8 = vector.broadcast %cst_5 : bf16 to vector<16x128xbf16>
    %9 = arith.cmpf ogt, %7, %8 : vector<16x128xbf16>
    %cst_6 = arith.constant 0.000000e+00 : bf16
    %10 = vector.broadcast %cst_6 : bf16 to vector<16x128xbf16>
    %11 = arith.minimumf %7, %10 : vector<16x128xbf16>
    %12 = math.exp %11 : vector<16x128xbf16>
    %cst_7 = arith.constant 1.000000e+00 : bf16
    %13 = vector.broadcast %cst_7 : bf16 to vector<16x128xbf16>
    %14 = arith.subf %12, %13 : vector<16x128xbf16>
    %15 = arith.select %9, %7, %14 : vector<16x128xi1>, vector<16x128xbf16>
    %c0_8 = arith.constant 0 : index
    %c0_9 = arith.constant 0 : index
    %16 = vector.load %arg4[%c0_8, %c0_9] : memref<128x128xbf16, #tpu.memory_space<vmem>>, vector<128x128xbf16>
    %c0_10 = arith.constant 0 : index
    %c0_11 = arith.constant 0 : index
    %17 = vector.load %arg5[%c0_10, %c0_11] : memref<1x128xf32, #tpu.memory_space<vmem>>, vector<1x128xf32>
    %cst_12 = arith.constant dense<0.000000e+00> : vector<16x128xf32>
    %18 = tpu.matmul %15, %16, %cst_12 {dimension_numbers = #tpu.dot_dimension_numbers<[1], [0], [0], [1], [0, 0, 1, 1], [], []>} : vector<16x128xbf16>, vector<128x128xbf16>, vector<16x128xf32> -> vector<16x128xf32>
    %19 = vector.broadcast %17 : vector<1x128xf32> to vector<16x128xf32>
    %20 = arith.addf %18, %19 : vector<16x128xf32>
    %21 = arith.truncf %20 : vector<16x128xf32> to vector<16x128xbf16>
    %cst_13 = arith.constant 0.000000e+00 : bf16
    %22 = vector.broadcast %cst_13 : bf16 to vector<16x128xbf16>
    %23 = arith.cmpf ogt, %21, %22 : vector<16x128xbf16>
    %cst_14 = arith.constant 0.000000e+00 : bf16
    %24 = vector.broadcast %cst_14 : bf16 to vector<16x128xbf16>
    %25 = arith.minimumf %21, %24 : vector<16x128xbf16>
    %26 = math.exp %25 : vector<16x128xbf16>
    %cst_15 = arith.constant 1.000000e+00 : bf16
    %27 = vector.broadcast %cst_15 : bf16 to vector<16x128xbf16>
    %28 = arith.subf %26, %27 : vector<16x128xbf16>
    %29 = arith.select %23, %21, %28 : vector<16x128xi1>, vector<16x128xbf16>
    %c0_16 = arith.constant 0 : index
    %c0_17 = arith.constant 0 : index
    %30 = vector.load %arg6[%c0_16, %c0_17] : memref<128x128xbf16, #tpu.memory_space<vmem>>, vector<128x128xbf16>
    %c0_18 = arith.constant 0 : index
    %c0_19 = arith.constant 0 : index
    %31 = vector.load %arg7[%c0_18, %c0_19] : memref<1x128xf32, #tpu.memory_space<vmem>>, vector<1x128xf32>
    %cst_20 = arith.constant dense<0.000000e+00> : vector<16x128xf32>
    %32 = tpu.matmul %29, %30, %cst_20 {dimension_numbers = #tpu.dot_dimension_numbers<[1], [0], [0], [1], [0, 0, 1, 1], [], []>} : vector<16x128xbf16>, vector<128x128xbf16>, vector<16x128xf32> -> vector<16x128xf32>
    %33 = vector.broadcast %31 : vector<1x128xf32> to vector<16x128xf32>
    %34 = arith.addf %32, %33 : vector<16x128xf32>
    %c0_21 = arith.constant 0 : index
    %c0_22 = arith.constant 0 : index
    %35 = vector.load %arg8[%c0_21, %c0_22] : memref<16x128xf32, #tpu.memory_space<vmem>>, vector<16x128xf32>
    tpu.vector_store %arg8[%c0_21, %c0_22], %34 {strides = array<i32>} : memref<16x128xf32, #tpu.memory_space<vmem>>, vector<16x128xf32>,
    return
  }
  func.func @transform_0(%arg0: i32) -> (i32, i32) {
    %c0_i32 = arith.constant 0 : i32
    %c0_i32_0 = arith.constant 0 : i32
    return %arg0, %c0_i32 : i32, i32
  }
  func.func @transform_1(%arg0: i32) -> (i32, i32) {
    %c0_i32 = arith.constant 0 : i32
    %c0_i32_0 = arith.constant 0 : i32
    %c0_i32_1 = arith.constant 0 : i32
    return %c0_i32, %c0_i32_0 : i32, i32
  }
  func.func @transform_2(%arg0: i32) -> (i32, i32) {
    %c0_i32 = arith.constant 0 : i32
    %c0_i32_0 = arith.constant 0 : i32
    %c0_i32_1 = arith.constant 0 : i32
    return %c0_i32, %c0_i32_0 : i32, i32
  }
  func.func @transform_3(%arg0: i32) -> (i32, i32) {
    %c0_i32 = arith.constant 0 : i32
    %c0_i32_0 = arith.constant 0 : i32
    %c0_i32_1 = arith.constant 0 : i32
    return %c0_i32, %c0_i32_0 : i32, i32
  }
  func.func @transform_4(%arg0: i32) -> (i32, i32) {
    %c0_i32 = arith.constant 0 : i32
    %c0_i32_0 = arith.constant 0 : i32
    %c0_i32_1 = arith.constant 0 : i32
    return %c0_i32, %c0_i32_0 : i32, i32
  }
  func.func @transform_5(%arg0: i32) -> (i32, i32) {
    %c0_i32 = arith.constant 0 : i32
    %c0_i32_0 = arith.constant 0 : i32
    %c0_i32_1 = arith.constant 0 : i32
    return %c0_i32, %c0_i32_0 : i32, i32
  }
  func.func @transform_6(%arg0: i32) -> (i32, i32) {
    %c0_i32 = arith.constant 0 : i32
    %c0_i32_0 = arith.constant 0 : i32
    %c0_i32_1 = arith.constant 0 : i32
    return %c0_i32, %c0_i32_0 : i32, i32
  }
  func.func @transform_7(%arg0: i32) -> (i32, i32) {
    %c0_i32 = arith.constant 0 : i32
    %c0_i32_0 = arith.constant 0 : i32
    return %arg0, %c0_i32 : i32, i32
  }
}

</mosaic_0001>

<bundles_post_ra>
// kernel: tpu_custom_call.1
= control target key start
LH: loop header
LB: loop body
LE: loop exit
PB: predicated region body
PF: predicated region fallthrough
CT: control target
= control target key end

     0   :  { %12 = vsyncpa [#allocation3], 0  ;;  %s709_s0 = inlined_call_operand.hbm [shape: f32[16,32], index: 0, kind: input, shape index: {}]   ;;  %s710_s1 = inlined_call_operand.hbm [shape: bf16[32,128], index: 1, kind: input, shape index: {}]   ;;  %s711_s2 = inlined_call_operand.vmem [shape: f32[1,128], index: 2, kind: input, shape index: {}]   ;;  %s712_s3 = inlined_call_operand.hbm [shape: bf16[128,128], index: 3, kind: input, shape index: {}]   ;;  %s713_s4 = inlined_call_operand.vmem [shape: f32[1,128], index: 4, kind: input, shape index: {}]   ;;  %s714_s5 = inlined_call_operand.hbm [shape: bf16[128,128], index: 5, kind: input, shape index: {}]   ;;  %s715_s6 = inlined_call_operand.vmem [shape: f32[1,128], index: 6, kind: input, shape index: {}]   ;;  %s716_s7 = inlined_call_operand.hbm [shape: f32[16,128], index: 7, kind: output, shape index: {}]  }
   0x1   :  { %13 = vsyncpa [#allocation6], 0 }
   0x2   :  { %14 = vsyncpa [#allocation9], 0  ;;  %s33_s26 = sshll.u32 %s710_s1, 4  ;;  %s34_s26 = int_to_ptr.hbm [resolvable:$true] %s33_s26 }
   0x3   :  { %15 = vsyncpa [#allocation4], 0  ;;  %s630_s27 = smov [#allocation5]   ;;  %s20_s8 = sshll.u32 %s709_s0, 4  ;;  %s21_s8 = int_to_ptr.hbm [resolvable:$true] %s20_s8 }
   0x4   :  { %s35_s28 = sshll.u32 %s630_s27, 4  ;;  %s631_s9 = smov 64   ;;  %s36_s28 = int_to_ptr.vmem [resolvable:$true] %s35_s28 }
   0x5   :  { %s632_s10 = smov 4   ;;  %s633_s11 = smov [#allocation2]  }
   0x6   :  { %41 = dma.hbm_to_vmem [thread:$0]  %s34_s26, 256, %s36_s28, [#allocation6], %s631_s9, %s631_s9, %s632_s10  }
   0x7   :  { %s22_s12 = sshll.u32 %s633_s11, 4  ;;  %s634_s13 = smov 128   ;;  %s23_s12 = int_to_ptr.vmem [resolvable:$true] %s22_s12 }
   0x8   :  { %s635_s14 = smov 8   ;;  %s48_s16 = sshll.u32 %s712_s3, 4  ;;  %s49_s16 = int_to_ptr.hbm [resolvable:$true] %s48_s16 }
   0x9   :  { %28 = dma.hbm_to_vmem [thread:$0]  %s21_s8, 256, %s23_s12, [#allocation3], %s634_s13, %s634_s13, %s635_s14  }
   0xa   :  { %s636_s17 = smov [#allocation7]   ;;  %s63_s20 = sshll.u32 %s714_s5, 4  ;;  %s64_s20 = int_to_ptr.hbm [resolvable:$true] %s63_s20 }
   0xb   :  { %s50_s0 = sshll.u32 %s636_s17, 4  ;;  %s637_s21 = smov [#allocation8]   ;;  %s51_s0 = int_to_ptr.vmem [resolvable:$true] %s50_s0 }
   0xc   :  { %56 = dma.hbm_to_vmem [thread:$0]  %s49_s16, 1024, %s51_s0, [#allocation6], %s631_s9, %s631_s9, %s632_s10  }
   0xd   :  { %s65_s22 = sshll.u32 %s637_s21, 4  ;;  %s66_s22 = int_to_ptr.vmem [resolvable:$true] %s65_s22 }
   0xe   :  { %71 = dma.hbm_to_vmem [thread:$0]  %s64_s20, 1024, %s66_s22, [#allocation9], %s631_s9, %s631_s9, %s632_s10  }
   0xf   :  { %622 = dma.done.wait [#allocation3], 256  }
  0x10   :  { %623 = vsyncadd [#allocation3], 4294967040 }
  0x11   :  { %624 = dma.done.wait [#allocation6], 1280  }
  0x12   :  { %625 = vsyncadd [#allocation6], 4294966016 }
  0x13   :  { %626 = dma.done.wait [#allocation9], 1024  }
  0x14   :  { %627 = vsyncadd [#allocation9], 4294966272  ;;  %v465_v0 = vld [vmem:[#allocation5 + $0x8] sm:$0xff]  ;;  %v464_v1 = vld [vmem:[#allocation5] sm:$0xff]  ;;  %vm114_vm0 = vcmask 261120   ;;  %s638_s25 = smov [#allocation10]  }
  0x15   :  { %v91_v2 = vld [vmem:[#allocation2] sm:$0xff]  ;;  %124 = vmatpush.bf16.msra.mxu0 %v465_v0  ;;  %v92_v3 = vld [vmem:[#allocation2 + $0x8] sm:$0xff]  ;;  %v473_v5 = vld [vmem:[#allocation7 + $0x38] sm:$0xff]  ;;  %s370_s26 = sshll.u32 %s638_s25, 4  ;;  %s372_s29 = sshll.u32 %s716_s7, 4  ;;  %s371_s26 = int_to_ptr.vmem [resolvable:$true] %s370_s26  ;;  %s373_s29 = int_to_ptr.hbm [resolvable:$true] %s372_s29 }
  0x16   :  { %v93_v4 = vpack.c.bf16 %v92_v3, %v91_v2  ;;  %234 = vmatpush.bf16.msra.mxu1 %v473_v5  ;;  %v472_v6 = vld [vmem:[#allocation7 + $0x30] sm:$0xff]  ;;  %v471_v7 = vld [vmem:[#allocation7 + $0x28] sm:$0xff]  ;;  %v470_v8 = vld [vmem:[#allocation7 + $0x20] sm:$0xff] }
  0x17   :  { %v469_v9 = vld [vmem:[#allocation7 + $0x18] sm:$0xff]  ;;  %v491_v10 = vld [vmem:[%s711_s2] ss:$0 sm:$0xff]  ;;  %v468_v11 = vld [vmem:[#allocation7 + $0x10] sm:$0xff] }
  0x18   :  { %v467_v13 = vld [vmem:[#allocation7 + $0x8] sm:$0xff]  ;;  %v466_v16 = vld [vmem:[#allocation7] sm:$0xff]  ;;  %v481_v45 = vld [vmem:[#allocation8 + $0x38] sm:$0xff] }
  0x19   :  { %125 = vmatpush.bf16.msra.mxu0 %v464_v1  ;;  %350 = vmatpush.bf16.msra.mxu2 %v481_v45  ;;  %v480_v46 = vld [vmem:[#allocation8 + $0x30] sm:$0xff]  ;;  %v479_v47 = vld [vmem:[#allocation8 + $0x28] sm:$0xff]  ;;  %v478_v48 = vld [vmem:[#allocation8 + $0x20] sm:$0xff] }
  0x1a   :  { %235 = vmatpush.bf16.msra.mxu1 %v472_v6  ;;  %v477_v49 = vld [vmem:[#allocation8 + $0x18] sm:$0xff]  ;;  %v492_v50 = vld [vmem:[%s713_s4] ss:$0 sm:$0xff]  ;;  %v476_v51 = vld [vmem:[#allocation8 + $0x10] sm:$0xff] }
  0x1b   :  { %v475_v53 = vld [vmem:[#allocation8 + $0x8] sm:$0xff]  ;;  %v474_v56 = vld [vmem:[#allocation8] sm:$0xff] }
  0x1c   :  { %395 = vmatmul.msk.bf16.vlgmr.msra.gmra.mxu0 %vm114_vm0, %v93_v4 }
  0x1d   :  { %351 = vmatpush.bf16.msra.mxu2 %v480_v46 }
  0x1e   :  { %236 = vmatpush.bf16.msra.mxu1 %v471_v7 }
  0x21   :  { %352 = vmatpush.bf16.msra.mxu2 %v479_v47 }
  0x22   :  { %237 = vmatpush.bf16.msra.mxu1 %v470_v8 }
  0x25   :  { %353 = vmatpush.bf16.msra.mxu2 %v478_v48 }
  0x26   :  { %238 = vmatpush.bf16.msra.mxu1 %v469_v9 }
  0x29   :  { %354 = vmatpush.bf16.msra.mxu2 %v477_v49 }
  0x2a   :  { %239 = vmatpush.bf16.msra.mxu1 %v468_v11 }
  0x2d   :  { %355 = vmatpush.bf16.msra.mxu2 %v476_v51 }
  0x2e   :  { %240 = vmatpush.bf16.msra.mxu1 %v467_v13 }
  0x31   :  { %356 = vmatpush.bf16.msra.mxu2 %v475_v53 }
  0x32   :  { %241 = vmatpush.bf16.msra.mxu1 %v466_v16 }
  0x35   :  { %357 = vmatpush.bf16.msra.mxu2 %v474_v56 }
  0x99   :  { %v127_v12 = vpop.f32.mrf.mxu0 }
  0x9a   :  { %v128_v14 = vadd.f32 %v491_v10, %v127_v12 }
  0x9c   :  { %v132_v15 = vpack.c.bf16 %v128_v14, %v128_v14 }
  0x9e   :  { %v134_v17 = vunpack.c.l.bf16 %v132_v15 }
  0xa0   :  { %v138_v18 = vmin.f32 %v134_v17, 0.0  ;;  %vm136_vm1 = vcmp.gt.f32.partialorder %v134_v17, 0.0 }
  0xa1   :  { %v129_v19 = vpop.f32.mrf.mxu0  ;;  %vm156_vm3 = vmpackc.low %vm136_vm1, %vm136_vm1 }
  0xa2   :  { %v140_v20 = vpack.c.bf16 %v138_v18, %v138_v18  ;;  %v130_v21 = vadd.f32 %v491_v10, %v129_v19 }
  0xa4   :  { %v142_v22 = vunpack.c.l.bf16 %v140_v20  ;;  %v133_v23 = vpack.c.bf16 %v130_v21, %v130_v21  ;;  %v493_v21 = vld [vmem:[%s715_s6] ss:$0 sm:$0xff] }
  0xa6   :  { %v144_v24 = vmul.f32 1.442695, %v142_v22  ;;  %v135_v25 = vunpack.c.l.bf16 %v133_v23 }
  0xa8   :  { %494 = vpow2.f32 %v144_v24  ;;  %v139_v26 = vmin.f32 %v135_v25, 0.0  ;;  %vm137_vm2 = vcmp.gt.f32.partialorder %v135_v25, 0.0 }
  0xa9   :  { %vm157_vm4 = vmpackc.low %vm137_vm2, %vm137_vm2 }
  0xaa   :  { %v141_v27 = vpack.c.bf16 %v139_v26, %v139_v26 }
  0xac   :  { %v143_v28 = vunpack.c.l.bf16 %v141_v27 }
  0xae   :  { %v495_v29 = vpop.eup %494  ;;  %v146_v30 = vmul.f32 1.442695, %v143_v28 }
  0xaf   :  { %v148_v31 = vpack.c.bf16 %v495_v29, %v495_v29 }
  0xb0   :  { %496 = vpow2.f32 %v146_v30 }
  0xb1   :  { %v150_v32 = vunpack.c.l.bf16 %v148_v31 }
  0xb3   :  { %v396_v33 = vadd.f32 -1.0, %v150_v32 }
  0xb5   :  { %v154_v37 = vpack.c.bf16 %v396_v33, %v396_v33 }
  0xb6   :  { %v497_v34 = vpop.eup %496 }
  0xb7   :  { %v149_v35 = vpack.c.bf16 %v497_v34, %v497_v34  ;;  %v158_v40 = vsel %vm156_vm3, %v132_v15, %v154_v37 }
  0xb8   :  { %v182_v42 = vunpack.c.l.b16 %v158_v40 }
  0xb9   :  { %v151_v36 = vunpack.c.l.bf16 %v149_v35 }
  0xbb   :  { %v397_v38 = vadd.f32 -1.0, %v151_v36 }
  0xbd   :  { %v155_v39 = vpack.c.bf16 %v397_v38, %v397_v38 }
  0xbf   :  { %v159_v41 = vsel %vm157_vm4, %v133_v23, %v155_v39 }
  0xc0   :  { %v183_v43 = vunpack.c.l.b16 %v159_v41 }
  0xc2   :  { %v184_v44 = vpack.c.b16 %v183_v43, %v182_v42 }
  0xc4   :  { %242 = vmatmul.bf16.vlgmr.msra.gmra.mxu1 %v184_v44 }
 0x141   :  { %v243_v52 = vpop.f32.mrf.mxu1 }
 0x142   :  { %v244_v54 = vadd.f32 %v492_v50, %v243_v52 }
 0x144   :  { %v248_v55 = vpack.c.bf16 %v244_v54, %v244_v54 }
 0x146   :  { %v250_v57 = vunpack.c.l.bf16 %v248_v55 }
 0x148   :  { %v254_v58 = vmin.f32 %v250_v57, 0.0  ;;  %vm252_vm5 = vcmp.gt.f32.partialorder %v250_v57, 0.0 }
 0x149   :  { %v245_v59 = vpop.f32.mrf.mxu1  ;;  %vm272_vm7 = vmpackc.low %vm252_vm5, %vm252_vm5 }
 0x14a   :  { %v256_v60 = vpack.c.bf16 %v254_v58, %v254_v58  ;;  %v246_v61 = vadd.f32 %v492_v50, %v245_v59 }
 0x14c   :  { %v258_v62 = vunpack.c.l.bf16 %v256_v60  ;;  %v249_v63 = vpack.c.bf16 %v246_v61, %v246_v61 }
 0x14e   :  { %v260_v0 = vmul.f32 1.442695, %v258_v62  ;;  %v251_v1 = vunpack.c.l.bf16 %v249_v63 }
 0x150   :  { %498 = vpow2.f32 %v260_v0  ;;  %v255_v2 = vmin.f32 %v251_v1, 0.0  ;;  %vm253_vm6 = vcmp.gt.f32.partialorder %v251_v1, 0.0 }
 0x151   :  { %vm273_vm8 = vmpackc.low %vm253_vm6, %vm253_vm6 }
 0x152   :  { %v257_v3 = vpack.c.bf16 %v255_v2, %v255_v2 }
 0x154   :  { %v259_v4 = vunpack.c.l.bf16 %v257_v3 }
 0x156   :  { %v499_v5 = vpop.eup %498  ;;  %v262_v6 = vmul.f32 1.442695, %v259_v4 }
 0x157   :  { %v264_v7 = vpack.c.bf16 %v499_v5, %v499_v5 }
 0x158   :  { %500 = vpow2.f32 %v262_v6 }
 0x159   :  { %v266_v8 = vunpack.c.l.bf16 %v264_v7 }
 0x15b   :  { %v430_v9 = vadd.f32 -1.0, %v266_v8 }
 0x15d   :  { %v270_v13 = vpack.c.bf16 %v430_v9, %v430_v9 }
 0x15e   :  { %v501_v10 = vpop.eup %500 }
 0x15f   :  { %v265_v11 = vpack.c.bf16 %v501_v10, %v501_v10  ;;  %v274_v16 = vsel %vm272_vm7, %v248_v55, %v270_v13 }
 0x160   :  { %v298_v18 = vunpack.c.l.b16 %v274_v16 }
 0x161   :  { %v267_v12 = vunpack.c.l.bf16 %v265_v11 }
 0x163   :  { %v431_v14 = vadd.f32 -1.0, %v267_v12 }
 0x165   :  { %v271_v15 = vpack.c.bf16 %v431_v14, %v431_v14 }
 0x167   :  { %v275_v17 = vsel %vm273_vm8, %v249_v63, %v271_v15 }
 0x168   :  { %v299_v19 = vunpack.c.l.b16 %v275_v17 }
 0x16a   :  { %v300_v20 = vpack.c.b16 %v299_v19, %v298_v18 }
 0x16c   :  { %358 = vmatmul.bf16.vlgmr.msra.gmra.mxu2 %v300_v20 }
 0x1ef   :  { %v359_v22 = vpop.f32.mrf.mxu2 }
 0x1f0   :  { %v360_v23 = vadd.f32 %v493_v21, %v359_v22 }
 0x1f2   :  { %364 = vst [vmem:[#allocation10] sm:$0xff] %v360_v23 }
 0x1f7   :  { %v361_v24 = vpop.f32.mrf.mxu2 }
 0x1f8   :  { %v362_v25 = vadd.f32 %v493_v21, %v361_v24 }
 0x1fa   :  { %365 = vst [vmem:[#allocation10 + $0x8] sm:$0xff] %v362_v25 }
 0x1fb   :  { %378 = dma.vmem_to_hbm [thread:$0]  %s371_s26, 256, %s373_s29, [#allocation4], %s634_s13, %s634_s13, %s635_s14  }
 0x1fc   :  { %628 = dma.done.wait [#allocation4], 256  }
 0x1fd   :  { %629 = vsyncadd [#allocation4], 4294967040 }
 0x1fe   :  { %383 = vsyncpa [#allocation3], 1 }
 0x1ff   :  { %384 = vsyncpa [#allocation6], 1 }
 0x200   :  { %385 = vsyncpa [#allocation9], 1 }
 0x201   :  { %386 = vsyncpa [#allocation4], 1 }

// kernel: tpu_custom_call.1
= control target key start
LH: loop header
LB: loop body
LE: loop exit
PB: predicated region body
PF: predicated region fallthrough
CT: control target
= control target key end

     0   :  { %12 = vsyncpa [#allocation3], 0  ;;  %s709_s0 = inlined_call_operand.hbm [shape: f32[16,32], index: 0, kind: input, shape index: {}]   ;;  %s710_s1 = inlined_call_operand.hbm [shape: bf16[32,128], index: 1, kind: input, shape index: {}]   ;;  %s711_s2 = inlined_call_operand.vmem [shape: f32[1,128], index: 2, kind: input, shape index: {}]   ;;  %s712_s3 = inlined_call_operand.hbm [shape: bf16[128,128], index: 3, kind: input, shape index: {}]   ;;  %s713_s4 = inlined_call_operand.vmem [shape: f32[1,128], index: 4, kind: input, shape index: {}]   ;;  %s714_s5 = inlined_call_operand.hbm [shape: bf16[128,128], index: 5, kind: input, shape index: {}]   ;;  %s715_s6 = inlined_call_operand.vmem [shape: f32[1,128], index: 6, kind: input, shape index: {}]   ;;  %s716_s7 = inlined_call_operand.hbm [shape: f32[16,128], index: 7, kind: output, shape index: {}]  }
   0x1   :  { %13 = vsyncpa [#allocation6], 0 }
   0x2   :  { %14 = vsyncpa [#allocation9], 0  ;;  %s33_s26 = sshll.u32 %s710_s1, 4  ;;  %s34_s26 = int_to_ptr.hbm [resolvable:$true] %s33_s26 }
   0x3   :  { %15 = vsyncpa [#allocation4], 0  ;;  %s630_s27 = smov [#allocation5]   ;;  %s20_s8 = sshll.u32 %s709_s0, 4  ;;  %s21_s8 = int_to_ptr.hbm [resolvable:$true] %s20_s8 }
   0x4   :  { %s35_s28 = sshll.u32 %s630_s27, 4  ;;  %s631_s9 = smov 64   ;;  %s36_s28 = int_to_ptr.vmem [resolvable:$true] %s35_s28 }
   0x5   :  { %s632_s10 = smov 4   ;;  %s633_s11 = smov [#allocation2]  }
   0x6   :  { %41 = dma.hbm_to_vmem [thread:$0]  %s34_s26, 256, %s36_s28, [#allocation6], %s631_s9, %s631_s9, %s632_s10  }
   0x7   :  { %s22_s12 = sshll.u32 %s633_s11, 4  ;;  %s634_s13 = smov 128   ;;  %s23_s12 = int_to_ptr.vmem [resolvable:$true] %s22_s12 }
   0x8   :  { %s635_s14 = smov 8   ;;  %s48_s16 = sshll.u32 %s712_s3, 4  ;;  %s49_s16 = int_to_ptr.hbm [resolvable:$true] %s48_s16 }
   0x9   :  { %28 = dma.hbm_to_vmem [thread:$0]  %s21_s8, 256, %s23_s12, [#allocation3], %s634_s13, %s634_s13, %s635_s14  }
   0xa   :  { %s636_s17 = smov [#allocation7]   ;;  %s63_s20 = sshll.u32 %s714_s5, 4  ;;  %s64_s20 = int_to_ptr.hbm [resolvable:$true] %s63_s20 }
   0xb   :  { %s50_s0 = sshll.u32 %s636_s17, 4  ;;  %s637_s21 = smov [#allocation8]   ;;  %s51_s0 = int_to_ptr.vmem [resolvable:$true] %s50_s0 }
   0xc   :  { %56 = dma.hbm_to_vmem [thread:$0]  %s49_s16, 1024, %s51_s0, [#allocation6], %s631_s9, %s631_s9, %s632_s10  }
   0xd   :  { %s65_s22 = sshll.u32 %s637_s21, 4  ;;  %s66_s22 = int_to_ptr.vmem [resolvable:$true] %s65_s22 }
   0xe   :  { %71 = dma.hbm_to_vmem [thread:$0]  %s64_s20, 1024, %s66_s22, [#allocation9], %s631_s9, %s631_s9, %s632_s10  }
   0xf   :  { %622 = dma.done.wait [#allocation3], 256  }
  0x10   :  { %623 = vsyncadd [#allocation3], 4294967040 }
  0x11   :  { %624 = dma.done.wait [#allocation6], 1280  }
  0x12   :  { %625 = vsyncadd [#allocation6], 4294966016 }
  0x13   :  { %626 = dma.done.wait [#allocation9], 1024  }
  0x14   :  { %627 = vsyncadd [#allocation9], 4294966272  ;;  %v465_v0 = vld [vmem:[#allocation5 + $0x8] sm:$0xff]  ;;  %v464_v1 = vld [vmem:[#allocation5] sm:$0xff]  ;;  %vm114_vm0 = vcmask 261120   ;;  %s638_s25 = smov [#allocation10]  }
  0x15   :  { %v91_v2 = vld [vmem:[#allocation2] sm:$0xff]  ;;  %124 = vmatpush.bf16.msra.mxu0 %v465_v0  ;;  %v92_v3 = vld [vmem:[#allocation2 + $0x8] sm:$0xff]  ;;  %v473_v5 = vld [vmem:[#allocation7 + $0x38] sm:$0xff]  ;;  %s370_s26 = sshll.u32 %s638_s25, 4  ;;  %s372_s29 = sshll.u32 %s716_s7, 4  ;;  %s371_s26 = int_to_ptr.vmem [resolvable:$true] %s370_s26  ;;  %s373_s29 = int_to_ptr.hbm [resolvable:$true] %s372_s29 }
  0x16   :  { %v93_v4 = vpack.c.bf16 %v92_v3, %v91_v2  ;;  %234 = vmatpush.bf16.msra.mxu1 %v473_v5  ;;  %v472_v6 = vld [vmem:[#allocation7 + $0x30] sm:$0xff]  ;;  %v471_v7 = vld [vmem:[#allocation7 + $0x28] sm:$0xff]  ;;  %v470_v8 = vld [vmem:[#allocation7 + $0x20] sm:$0xff] }
  0x17   :  { %v469_v9 = vld [vmem:[#allocation7 + $0x18] sm:$0xff]  ;;  %v491_v10 = vld [vmem:[%s711_s2] ss:$0 sm:$0xff]  ;;  %v468_v11 = vld [vmem:[#allocation7 + $0x10] sm:$0xff] }
  0x18   :  { %v467_v13 = vld [vmem:[#allocation7 + $0x8] sm:$0xff]  ;;  %v466_v16 = vld [vmem:[#allocation7] sm:$0xff]  ;;  %v481_v45 = vld [vmem:[#allocation8 + $0x38] sm:$0xff] }
  0x19   :  { %125 = vmatpush.bf16.msra.mxu0 %v464_v1  ;;  %350 = vmatpush.bf16.msra.mxu2 %v481_v45  ;;  %v480_v46 = vld [vmem:[#allocation8 + $0x30] sm:$0xff]  ;;  %v479_v47 = vld [vmem:[#allocation8 + $0x28] sm:$0xff]  ;;  %v478_v48 = vld [vmem:[#allocation8 + $0x20] sm:$0xff] }
  0x1a   :  { %235 = vmatpush.bf16.msra.mxu1 %v472_v6  ;;  %v477_v49 = vld [vmem:[#allocation8 + $0x18] sm:$0xff]  ;;  %v492_v50 = vld [vmem:[%s713_s4] ss:$0 sm:$0xff]  ;;  %v476_v51 = vld [vmem:[#allocation8 + $0x10] sm:$0xff] }
  0x1b   :  { %v475_v53 = vld [vmem:[#allocation8 + $0x8] sm:$0xff]  ;;  %v474_v56 = vld [vmem:[#allocation8] sm:$0xff] }
  0x1c   :  { %395 = vmatmul.msk.bf16.vlgmr.msra.gmra.mxu0 %vm114_vm0, %v93_v4 }
  0x1d   :  { %351 = vmatpush.bf16.msra.mxu2 %v480_v46 }
  0x1e   :  { %236 = vmatpush.bf16.msra.mxu1 %v471_v7 }
  0x21   :  { %352 = vmatpush.bf16.msra.mxu2 %v479_v47 }
  0x22   :  { %237 = vmatpush.bf16.msra.mxu1 %v470_v8 }
  0x25   :  { %353 = vmatpush.bf16.msra.mxu2 %v478_v48 }
  0x26   :  { %238 = vmatpush.bf16.msra.mxu1 %v469_v9 }
  0x29   :  { %354 = vmatpush.bf16.msra.mxu2 %v477_v49 }
  0x2a   :  { %239 = vmatpush.bf16.msra.mxu1 %v468_v11 }
  0x2d   :  { %355 = vmatpush.bf16.msra.mxu2 %v476_v51 }
  0x2e   :  { %240 = vmatpush.bf16.msra.mxu1 %v467_v13 }
  0x31   :  { %356 = vmatpush.bf16.msra.mxu2 %v475_v53 }
  0x32   :  { %241 = vmatpush.bf16.msra.mxu1 %v466_v16 }
  0x35   :  { %357 = vmatpush.bf16.msra.mxu2 %v474_v56 }
  0x99   :  { %v127_v12 = vpop.f32.mrf.mxu0 }
  0x9a   :  { %v128_v14 = vadd.f32 %v491_v10, %v127_v12 }
  0x9c   :  { %v132_v15 = vpack.c.bf16 %v128_v14, %v128_v14 }
  0x9e   :  { %v134_v17 = vunpack.c.l.bf16 %v132_v15 }
  0xa0   :  { %v138_v18 = vmin.f32 %v134_v17, 0.0  ;;  %vm136_vm1 = vcmp.gt.f32.partialorder %v134_v17, 0.0 }
  0xa1   :  { %v129_v19 = vpop.f32.mrf.mxu0  ;;  %vm156_vm3 = vmpackc.low %vm136_vm1, %vm136_vm1 }
  0xa2   :  { %v140_v20 = vpack.c.bf16 %v138_v18, %v138_v18  ;;  %v130_v21 = vadd.f32 %v491_v10, %v129_v19 }
  0xa4   :  { %v142_v22 = vunpack.c.l.bf16 %v140_v20  ;;  %v133_v23 = vpack.c.bf16 %v130_v21, %v130_v21  ;;  %v493_v21 = vld [vmem:[%s715_s6] ss:$0 sm:$0xff] }
  0xa6   :  { %v144_v24 = vmul.f32 1.442695, %v142_v22  ;;  %v135_v25 = vunpack.c.l.bf16 %v133_v23 }
  0xa8   :  { %494 = vpow2.f32 %v144_v24  ;;  %v139_v26 = vmin.f32 %v135_v25, 0.0  ;;  %vm137_vm2 = vcmp.gt.f32.partialorder %v135_v25, 0.0 }
  0xa9   :  { %vm157_vm4 = vmpackc.low %vm137_vm2, %vm137_vm2 }
  0xaa   :  { %v141_v27 = vpack.c.bf16 %v139_v26, %v139_v26 }
  0xac   :  { %v143_v28 = vunpack.c.l.bf16 %v141_v27 }
  0xae   :  { %v495_v29 = vpop.eup %494  ;;  %v146_v30 = vmul.f32 1.442695, %v143_v28 }
  0xaf   :  { %v148_v31 = vpack.c.bf16 %v495_v29, %v495_v29 }
  0xb0   :  { %496 = vpow2.f32 %v146_v30 }
  0xb1   :  { %v150_v32 = vunpack.c.l.bf16 %v148_v31 }
  0xb3   :  { %v396_v33 = vadd.f32 -1.0, %v150_v32 }
  0xb5   :  { %v154_v37 = vpack.c.bf16 %v396_v33, %v396_v33 }
  0xb6   :  { %v497_v34 = vpop.eup %496 }
  0xb7   :  { %v149_v35 = vpack.c.bf16 %v497_v34, %v497_v34  ;;  %v158_v40 = vsel %vm156_vm3, %v132_v15, %v154_v37 }
  0xb8   :  { %v182_v42 = vunpack.c.l.b16 %v158_v40 }
  0xb9   :  { %v151_v36 = vunpack.c.l.bf16 %v149_v35 }
  0xbb   :  { %v397_v38 = vadd.f32 -1.0, %v151_v36 }
  0xbd   :  { %v155_v39 = vpack.c.bf16 %v397_v38, %v397_v38 }
  0xbf   :  { %v159_v41 = vsel %vm157_vm4, %v133_v23, %v155_v39 }
  0xc0   :  { %v183_v43 = vunpack.c.l.b16 %v159_v41 }
  0xc2   :  { %v184_v44 = vpack.c.b16 %v183_v43, %v182_v42 }
  0xc4   :  { %242 = vmatmul.bf16.vlgmr.msra.gmra.mxu1 %v184_v44 }
 0x141   :  { %v243_v52 = vpop.f32.mrf.mxu1 }
 0x142   :  { %v244_v54 = vadd.f32 %v492_v50, %v243_v52 }
 0x144   :  { %v248_v55 = vpack.c.bf16 %v244_v54, %v244_v54 }
 0x146   :  { %v250_v57 = vunpack.c.l.bf16 %v248_v55 }
 0x148   :  { %v254_v58 = vmin.f32 %v250_v57, 0.0  ;;  %vm252_vm5 = vcmp.gt.f32.partialorder %v250_v57, 0.0 }
 0x149   :  { %v245_v59 = vpop.f32.mrf.mxu1  ;;  %vm272_vm7 = vmpackc.low %vm252_vm5, %vm252_vm5 }
 0x14a   :  { %v256_v60 = vpack.c.bf16 %v254_v58, %v254_v58  ;;  %v246_v61 = vadd.f32 %v492_v50, %v245_v59 }
 0x14c   :  { %v258_v62 = vunpack.c.l.bf16 %v256_v60  ;;  %v249_v63 = vpack.c.bf16 %v246_v61, %v246_v61 }
 0x14e   :  { %v260_v0 = vmul.f32 1.442695, %v258_v62  ;;  %v251_v1 = vunpack.c.l.bf16 %v249_v63 }
 0x150   :  { %498 = vpow2.f32 %v260_v0  ;;  %v255_v2 = vmin.f32 %v251_v1, 0.0  ;;  %vm253_vm6 = vcmp.gt.f32.partialorder %v251_v1, 0.0 }
 0x151   :  { %vm273_vm8 = vmpackc.low %vm253_vm6, %vm253_vm6 }
 0x152   :  { %v257_v3 = vpack.c.bf16 %v255_v2, %v255_v2 }
 0x154   :  { %v259_v4 = vunpack.c.l.bf16 %v257_v3 }
 0x156   :  { %v499_v5 = vpop.eup %498  ;;  %v262_v6 = vmul.f32 1.442695, %v259_v4 }
 0x157   :  { %v264_v7 = vpack.c.bf16 %v499_v5, %v499_v5 }
 0x158   :  { %500 = vpow2.f32 %v262_v6 }
 0x159   :  { %v266_v8 = vunpack.c.l.bf16 %v264_v7 }
 0x15b   :  { %v430_v9 = vadd.f32 -1.0, %v266_v8 }
 0x15d   :  { %v270_v13 = vpack.c.bf16 %v430_v9, %v430_v9 }
 0x15e   :  { %v501_v10 = vpop.eup %500 }
 0x15f   :  { %v265_v11 = vpack.c.bf16 %v501_v10, %v501_v10  ;;  %v274_v16 = vsel %vm272_vm7, %v248_v55, %v270_v13 }
 0x160   :  { %v298_v18 = vunpack.c.l.b16 %v274_v16 }
 0x161   :  { %v267_v12 = vunpack.c.l.bf16 %v265_v11 }
 0x163   :  { %v431_v14 = vadd.f32 -1.0, %v267_v12 }
 0x165   :  { %v271_v15 = vpack.c.bf16 %v431_v14, %v431_v14 }
 0x167   :  { %v275_v17 = vsel %vm273_vm8, %v249_v63, %v271_v15 }
 0x168   :  { %v299_v19 = vunpack.c.l.b16 %v275_v17 }
 0x16a   :  { %v300_v20 = vpack.c.b16 %v299_v19, %v298_v18 }
 0x16c   :  { %358 = vmatmul.bf16.vlgmr.msra.gmra.mxu2 %v300_v20 }
 0x1ef   :  { %v359_v22 = vpop.f32.mrf.mxu2 }
 0x1f0   :  { %v360_v23 = vadd.f32 %v493_v21, %v359_v22 }
 0x1f2   :  { %364 = vst [vmem:[#allocation10] sm:$0xff] %v360_v23 }
 0x1f7   :  { %v361_v24 = vpop.f32.mrf.mxu2 }
 0x1f8   :  { %v362_v25 = vadd.f32 %v493_v21, %v361_v24 }
 0x1fa   :  { %365 = vst [vmem:[#allocation10 + $0x8] sm:$0xff] %v362_v25 }
 0x1fb   :  { %378 = dma.vmem_to_hbm [thread:$0]  %s371_s26, 256, %s373_s29, [#allocation4], %s634_s13, %s634_s13, %s635_s14  }
 0x1fc   :  { %628 = dma.done.wait [#allocation4], 256  }
 0x1fd   :  { %629 = vsyncadd [#allocation4], 4294967040 }
 0x1fe   :  { %383 = vsyncpa [#allocation3], 1 }
 0x1ff   :  { %384 = vsyncpa [#allocation6], 1 }
 0x200   :  { %385 = vsyncpa [#allocation9], 1 }
 0x201   :  { %386 = vsyncpa [#allocation4], 1 }

</bundles_post_ra>
